<compile_context>
chip_gen: v5e
topology: v5e:2x2
jax: 0.10.0
libtpu: 0.0.40
codegen_flags: <defaults>
</compile_context>

<pallas_src>
import math

import jax
import jax.numpy as jnp
from jax.experimental import pallas as pl
from jax.experimental.pallas import tpu as pltpu


def _round_up(n, m):
    return ((n + m - 1) // m) * m


def _make_kernel(h_chunk_sizes, approx_sigmoid):
    """Build the fused fc1->SiLU->fc2 kernel for a static tuple of H-chunks."""

    def kernel(x_ref, w1_ref, b1_ref, w2_ref, b2_ref, o_ref, acc_ref):
        # x_ref : [tb, D_in]   pipelined (double-buffered) activation tile
        # w1_ref: [D_in, H]    resident VMEM (compute dtype, pre-cast at init)
        # b1_ref: [1, H]       resident VMEM
        # w2_ref: [H, H]       resident VMEM
        # b2_ref: [1, H]       resident VMEM
        # o_ref : [tb, H]      pipelined output tile
        # acc_ref: [tb, H] f32 VMEM scratch accumulator
        compute_dtype = w1_ref.dtype
        # In-kernel cast: free vreg op, halves x HBM traffic vs. a wrapper cast.
        x = x_ref[...].astype(compute_dtype)

        start = 0
        for c, ck in enumerate(h_chunk_sizes):
            w1_c = w1_ref[:, start:start + ck]
            b1_c = b1_ref[:, start:start + ck].astype(jnp.float32)
            w2_c = w2_ref[start:start + ck, :]

            # fc1 chunk (MXU, f32 accumulation) + bias
            h = jnp.dot(x, w1_c, preferred_element_type=jnp.float32) + b1_c
            # SiLU: h * sigmoid(h). exp + reciprocal both land on the EUP slot.
            a = h * pl.reciprocal(1.0 + jnp.exp(-h), approx=approx_sigmoid)
            # fc2 partial contribution of this H-chunk
            contrib = jnp.dot(a.astype(compute_dtype), w2_c,
                              preferred_element_type=jnp.float32)
            if c == 0:
                acc_ref[...] = contrib
            else:
                acc_ref[...] += contrib
            start += ck

        o_ref[...] = (acc_ref[...] + b2_ref[...].astype(jnp.float32)
                      ).astype(o_ref.dtype)

    return kernel


def vector_embedder_pallas(x, w1, b1, w2, b2, *, row_tile=256, h_chunk=512,
                           approx_sigmoid=None, out_dtype=None):
    """VectorEmbedder forward.

    x  : [B, D_in]            (any float dtype; cast to weight dtype in-kernel)
    w1 : [D_in, H]            (compute dtype, e.g. bf16 pre-cast once at init)
    b1 : [1, H]
    w2 : [H, H]               (compute dtype)
    b2 : [1, H]
    Returns [B, H] in `out_dtype` (defaults to x.dtype).
    """
    B, D_in = x.shape
    H = w1.shape[1]
    out_dtype = out_dtype or x.dtype
    compute_dtype = w1.dtype
    if approx_sigmoid is None:
        approx_sigmoid = jnp.dtype(compute_dtype) != jnp.dtype(jnp.float32)

    # ---- batch row tile ----
    # Multiple of 8 (f32 x-tile sublane) and, when B allows, small enough that
    # the grid has >= 2 steps so the "parallel" axis can use both v7x TCs.
    # (For v5e prefer row_tile=128; v6e/v7x like 256-multiples.)
    if B <= 8:
        tb = B                                   # single block == full batch dim
    else:
        tb = max(8, min(_round_up(row_tile, 8), _round_up(-(-B // 2), 8)))
    grid = (pl.cdiv(B, tb),)                     # ragged last block handled by Pallas

    # ---- hidden-dim chunking (fused fc1->SiLU->fc2) ----
    chunks, s = [], 0
    while s < H:
        chunks.append(min(h_chunk, H - s))
        s += chunks[-1]
    chunks = tuple(chunks)

    # ---- VMEM budget, capped at device capacity with headroom ----
    w_isz = jnp.dtype(compute_dtype).itemsize
    x_isz = jnp.dtype(x.dtype).itemsize
    o_isz = jnp.dtype(out_dtype).itemsize
    b_isz = jnp.dtype(b1.dtype).itemsize
    vmem_est = ((D_in * H + H * H) * w_isz       # resident weights (single buffer)
                + 2 * H * b_isz                  # resident biases
                + 2 * tb * D_in * x_isz          # x tile, double-buffered
                + 2 * tb * H * o_isz             # out tile, double-buffered
                + tb * H * 4                     # f32 accumulator scratch
                + 4 * tb * max(chunks) * 4)      # live chunk temporaries
    try:
        vmem_cap = int(pltpu.get_tpu_info().vmem_capacity_bytes)
    except Exception:  # pragma: no cover - conservative fallback (v7x size)
        vmem_cap = 64 * 1024 * 1024
    vmem_limit = int(min(max(vmem_est * 3 // 2, 32 * 1024 * 1024),
                         int(0.85 * vmem_cap)))

    flops = 2 * B * D_in * H + 2 * B * H * H + 5 * B * H
    bytes_accessed = (B * D_in * x_isz + (D_in * H + H * H) * w_isz
                      + 2 * H * b_isz + B * H * o_isz)

    kernel = _make_kernel(chunks, approx_sigmoid)

    return pl.pallas_call(
        kernel,
        out_shape=jax.ShapeDtypeStruct((B, H), out_dtype),
        grid=grid,
        in_specs=[
            # Activations: row-tiled along the batch, pipelined (double-buffered).
            pl.BlockSpec((tb, D_in), lambda i: (i, 0)),
            # Weights / biases: whole arrays resident in VMEM (one copy, no
            # per-grid-step re-DMA, no double-buffering).
            pl.BlockSpec(memory_space=pltpu.MemorySpace.VMEM),
            pl.BlockSpec(memory_space=pltpu.MemorySpace.VMEM),
            pl.BlockSpec(memory_space=pltpu.MemorySpace.VMEM),
            pl.BlockSpec(memory_space=pltpu.MemorySpace.VMEM),
        ],
        out_specs=pl.BlockSpec((tb, H), lambda i: (i, 0)),
        scratch_shapes=[pltpu.VMEM((tb, H), jnp.float32)],
        compiler_params=pltpu.CompilerParams(
            dimension_semantics=("parallel",),
            vmem_limit_bytes=vmem_limit),
        cost_estimate=pl.CostEstimate(
            flops=int(flops),
            transcendentals=int(B * H),
            bytes_accessed=int(bytes_accessed)),
    )(x, w1, b1, w2, b2)


def vector_embedder_ref(x, w1, b1, w2, b2):
    """Pure-JAX reference mirroring the PyTorch forward (all f32)."""
    h = x @ w1 + b1
    a = jax.nn.silu(h)
    return a @ w2 + b2


if __name__ == "__main__":
    # Small shapes consistent with the module: a flat vector per example.
    # hidden_size = 128 keeps the output lane-dense (multiple of 128).
    B, D_in, H = 4, 64, 128

    key = jax.random.PRNGKey(0)
    kx, kw1, kb1, kw2, kb2 = jax.random.split(key, 5)
    x = jax.random.normal(kx, (B, D_in), dtype=jnp.float32)
    # Deterministic synthetic parameters (not a checkpoint load).
    w1 = jax.random.normal(kw1, (D_in, H), dtype=jnp.float32) * (1.0 / math.sqrt(D_in))
    b1 = jax.random.normal(kb1, (1, H), dtype=jnp.float32) * 0.01
    w2 = jax.random.normal(kw2, (H, H), dtype=jnp.float32) * (1.0 / math.sqrt(H))
    b2 = jax.random.normal(kb2, (1, H), dtype=jnp.float32) * 0.01

    # One-off init-time bf16 copies of the weights (NOT a per-call cast).
    w1_bf16 = w1.astype(jnp.bfloat16)
    w2_bf16 = w2.astype(jnp.bfloat16)

    ref = vector_embedder_ref(x, w1, b1, w2, b2)

    # 1) f32 weights -> exact sigmoid, tight numerical check.
    out_f32 = jax.block_until_ready(vector_embedder_pallas(x, w1, b1, w2, b2))
    assert out_f32.shape == (B, H)
    assert jnp.allclose(out_f32, ref, rtol=1e-4, atol=1e-4), "f32 path mismatch"

    # 2) bf16 weights -> MXU-native path, approx reciprocal, looser tolerance.
    out_bf16 = jax.block_until_ready(
        vector_embedder_pallas(x, w1_bf16, b1, w2_bf16, b2))
    assert out_bf16.shape == (B, H)
    assert jnp.allclose(out_bf16, ref, rtol=5e-2, atol=5e-2), "bf16 path mismatch"

    # 3) Ragged multi-tile batch grid (B=40, tb=16 -> 3 steps, last block partial)
    #    combined with a multi-chunk hidden loop (H=256, h_chunk=128 -> 2 chunks).
    B2, H2 = 40, 256
    k2 = jax.random.split(jax.random.PRNGKey(1), 5)
    x2 = jax.random.normal(k2[0], (B2, D_in), dtype=jnp.float32)
    w1b = jax.random.normal(k2[1], (D_in, H2), dtype=jnp.float32) * (1.0 / math.sqrt(D_in))
    b1b = jax.random.normal(k2[2], (1, H2), dtype=jnp.float32) * 0.01
    w2b = jax.random.normal(k2[3], (H2, H2), dtype=jnp.float32) * (1.0 / math.sqrt(H2))
    b2b = jax.random.normal(k2[4], (1, H2), dtype=jnp.float32) * 0.01
    ref2 = vector_embedder_ref(x2, w1b, b1b, w2b, b2b)
    out2 = jax.block_until_ready(
        vector_embedder_pallas(x2, w1b.astype(jnp.bfloat16), b1b,
                               w2b.astype(jnp.bfloat16), b2b,
                               row_tile=16, h_chunk=128))
    assert out2.shape == (B2, H2)
    assert jnp.allclose(out2, ref2, rtol=5e-2, atol=5e-2), "ragged/chunked path mismatch"

    print("KERNEL_OK")
</pallas_src>

<mosaic_0001>
module attributes {stable_mosaic.version = 11 : i64} {
  func.func @kernel(%arg0: i32, %arg1: memref<4x64xf32, #tpu.memory_space<vmem>>, %arg2: memref<64x128xf32, #tpu.memory_space<vmem>>, %arg3: memref<1x128xf32, #tpu.memory_space<vmem>>, %arg4: memref<128x128xf32, #tpu.memory_space<vmem>>, %arg5: memref<1x128xf32, #tpu.memory_space<vmem>>, %arg6: memref<4x128xf32, #tpu.memory_space<vmem>>, %arg7: memref<4x128xf32, #tpu.memory_space<vmem>>) attributes {dimension_semantics = [#tpu.dimension_semantics<parallel>], iteration_bounds = array<i64: 1>, scalar_prefetch = 0 : i64, scratch_operands = 1 : i64, tpu.core_type = #tpu.core_type<tc>, window_params = [{transform_indices = @transform_0, window_bounds = array<i64: 4, 64>}, {pipeline_mode = #tpu.pipeline_mode<synchronous>, transform_indices = @transform_1, window_bounds = array<i64: 64, 128>}, {pipeline_mode = #tpu.pipeline_mode<synchronous>, transform_indices = @transform_2, window_bounds = array<i64: 1, 128>}, {pipeline_mode = #tpu.pipeline_mode<synchronous>, transform_indices = @transform_3, window_bounds = array<i64: 128, 128>}, {pipeline_mode = #tpu.pipeline_mode<synchronous>, transform_indices = @transform_4, window_bounds = array<i64: 1, 128>}, {transform_indices = @transform_5, window_bounds = array<i64: 4, 128>}]} {
    %c0 = arith.constant 0 : index
    %c0_0 = arith.constant 0 : index
    %0 = vector.load %arg1[%c0, %c0_0] : memref<4x64xf32, #tpu.memory_space<vmem>>, vector<4x64xf32>
    %c0_1 = arith.constant 0 : index
    %c0_2 = arith.constant 0 : index
    %1 = vector.load %arg2[%c0_1, %c0_2] : memref<64x128xf32, #tpu.memory_space<vmem>>, vector<64x128xf32>
    %c0_3 = arith.constant 0 : index
    %c0_4 = arith.constant 0 : index
    %2 = vector.load %arg3[%c0_3, %c0_4] : memref<1x128xf32, #tpu.memory_space<vmem>>, vector<1x128xf32>
    %c0_5 = arith.constant 0 : index
    %c0_6 = arith.constant 0 : index
    %3 = vector.load %arg4[%c0_5, %c0_6] : memref<128x128xf32, #tpu.memory_space<vmem>>, vector<128x128xf32>
    %cst = arith.constant dense<0.000000e+00> : vector<4x128xf32>
    %4 = tpu.matmul %0, %1, %cst {dimension_numbers = #tpu.dot_dimension_numbers<[1], [0], [0], [1], [0, 0, 1, 1], [], []>} : vector<4x64xf32>, vector<64x128xf32>, vector<4x128xf32> -> vector<4x128xf32>
    %5 = vector.broadcast %2 : vector<1x128xf32> to vector<4x128xf32>
    %6 = arith.addf %4, %5 : vector<4x128xf32>
    %cst_7 = arith.constant 0.000000e+00 : f32
    %7 = vector.broadcast %cst_7 : f32 to vector<4x128xf32>
    %8 = arith.subf %7, %6 : vector<4x128xf32>
    %9 = math.exp %8 : vector<4x128xf32>
    %cst_8 = arith.constant 1.000000e+00 : f32
    %10 = vector.broadcast %cst_8 : f32 to vector<4x128xf32>
    %11 = arith.addf %10, %9 : vector<4x128xf32>
    %12 = tpu.reciprocal %11 : vector<4x128xf32> -> vector<4x128xf32>
    %13 = arith.mulf %6, %12 : vector<4x128xf32>
    %cst_9 = arith.constant dense<0.000000e+00> : vector<4x128xf32>
    %14 = tpu.matmul %13, %3, %cst_9 {dimension_numbers = #tpu.dot_dimension_numbers<[1], [0], [0], [1], [0, 0, 1, 1], [], []>} : vector<4x128xf32>, vector<128x128xf32>, vector<4x128xf32> -> vector<4x128xf32>
    %c0_10 = arith.constant 0 : index
    %c0_11 = arith.constant 0 : index
    %15 = vector.load %arg7[%c0_10, %c0_11] : memref<4x128xf32, #tpu.memory_space<vmem>>, vector<4x128xf32>
    tpu.vector_store %arg7[%c0_10, %c0_11], %14 {strides = array<i32>} : memref<4x128xf32, #tpu.memory_space<vmem>>, vector<4x128xf32>,
    %c0_12 = arith.constant 0 : index
    %c0_13 = arith.constant 0 : index
    %16 = vector.load %arg7[%c0_12, %c0_13] : memref<4x128xf32, #tpu.memory_space<vmem>>, vector<4x128xf32>
    %c0_14 = arith.constant 0 : index
    %c0_15 = arith.constant 0 : index
    %17 = vector.load %arg5[%c0_14, %c0_15] : memref<1x128xf32, #tpu.memory_space<vmem>>, vector<1x128xf32>
    %18 = vector.broadcast %17 : vector<1x128xf32> to vector<4x128xf32>
    %19 = arith.addf %16, %18 : vector<4x128xf32>
    %c0_16 = arith.constant 0 : index
    %c0_17 = arith.constant 0 : index
    %20 = vector.load %arg6[%c0_16, %c0_17] : memref<4x128xf32, #tpu.memory_space<vmem>>, vector<4x128xf32>
    tpu.vector_store %arg6[%c0_16, %c0_17], %19 {strides = array<i32>} : memref<4x128xf32, #tpu.memory_space<vmem>>, vector<4x128xf32>,
    return
  }
  func.func @transform_0(%arg0: i32) -> (i32, i32) {
    %c0_i32 = arith.constant 0 : i32
    %c0_i32_0 = arith.constant 0 : i32
    return %arg0, %c0_i32 : i32, i32
  }
  func.func @transform_1(%arg0: i32) -> (i32, i32) {
    %c0_i32 = arith.constant 0 : i32
    %c0_i32_0 = arith.constant 0 : i32
    %c0_i32_1 = arith.constant 0 : i32
    return %c0_i32, %c0_i32_0 : i32, i32
  }
  func.func @transform_2(%arg0: i32) -> (i32, i32) {
    %c0_i32 = arith.constant 0 : i32
    %c0_i32_0 = arith.constant 0 : i32
    %c0_i32_1 = arith.constant 0 : i32
    return %c0_i32, %c0_i32_0 : i32, i32
  }
  func.func @transform_3(%arg0: i32) -> (i32, i32) {
    %c0_i32 = arith.constant 0 : i32
    %c0_i32_0 = arith.constant 0 : i32
    %c0_i32_1 = arith.constant 0 : i32
    return %c0_i32, %c0_i32_0 : i32, i32
  }
  func.func @transform_4(%arg0: i32) -> (i32, i32) {
    %c0_i32 = arith.constant 0 : i32
    %c0_i32_0 = arith.constant 0 : i32
    %c0_i32_1 = arith.constant 0 : i32
    return %c0_i32, %c0_i32_0 : i32, i32
  }
  func.func @transform_5(%arg0: i32) -> (i32, i32) {
    %c0_i32 = arith.constant 0 : i32
    %c0_i32_0 = arith.constant 0 : i32
    return %arg0, %c0_i32 : i32, i32
  }
}

</mosaic_0001>

<bundles_post_ra>
// kernel: tpu_custom_call.1
= control target key start
LH: loop header
LB: loop body
LE: loop exit
PB: predicated region body
PF: predicated region fallthrough
CT: control target
= control target key end

     0   :  { %10 = vsyncpa [#allocation4], 0  ;;  %s353_s0 = inlined_call_operand.hbm [shape: f32[4,64], index: 0, kind: input, shape index: {}]   ;;  %s354_s1 = inlined_call_operand.hbm [shape: f32[64,128], index: 1, kind: input, shape index: {}]   ;;  %s355_s2 = inlined_call_operand.vmem [shape: f32[1,128], index: 2, kind: input, shape index: {}]   ;;  %s356_s3 = inlined_call_operand.hbm [shape: f32[128,128], index: 3, kind: input, shape index: {}]   ;;  %s357_s4 = inlined_call_operand.vmem [shape: f32[1,128], index: 4, kind: input, shape index: {}]   ;;  %s358_s5 = inlined_call_operand.hbm [shape: f32[4,128], index: 5, kind: output, shape index: {}]  }
   0x1   :  { %11 = vsyncpa [#allocation7], 0  ;;  %s28_s20 = sshll.u32 %s354_s1, 4  ;;  %s29_s20 = int_to_ptr.hbm [resolvable:$true] %s28_s20 }
   0x2   :  { %12 = vsyncpa [#allocation5], 0  ;;  %s299_s21 = smov [#allocation6]   ;;  %s18_s25 = sshll.u32 %s353_s0, 4  ;;  %s19_s25 = int_to_ptr.hbm [resolvable:$true] %s18_s25 }
   0x3   :  { %s30_s22 = sshll.u32 %s299_s21, 4  ;;  %s300_s26 = smov 128   ;;  %s31_s22 = int_to_ptr.vmem [resolvable:$true] %s30_s22 }
   0x4   :  { %s301_s27 = smov 8   ;;  %s302_s28 = smov [#allocation3]  }
   0x5   :  { %36 = dma.hbm_to_vmem [thread:$0]  %s29_s20, 1024, %s31_s22, [#allocation7], %s300_s26, %s300_s26, %s301_s27  }
   0x6   :  { %s20_s29 = sshll.u32 %s302_s28, 4  ;;  %s43_s7 = sshll.u32 %s356_s3, 4  ;;  %s21_s29 = int_to_ptr.vmem [resolvable:$true] %s20_s29  ;;  %s44_s7 = int_to_ptr.hbm [resolvable:$true] %s43_s7 }
   0x7   :  { %23 = dma.hbm_to_vmem [thread:$0]  %s19_s25, 64, %s21_s29, [#allocation4]  }
   0x8   :  { %s303_s1 = smov [#allocation8]  }
   0x9   :  { %s45_s8 = sshll.u32 %s303_s1, 4  ;;  %s46_s8 = int_to_ptr.vmem [resolvable:$true] %s45_s8 }
   0xa   :  { %51 = dma.hbm_to_vmem [thread:$0]  %s44_s7, 2048, %s46_s8, [#allocation7], %s300_s26, %s300_s26, %s301_s27  }
   0xb   :  { %293 = dma.done.wait [#allocation4], 64  }
   0xc   :  { %294 = vsyncadd [#allocation4], 4294967232 }
   0xd   :  { %295 = dma.done.wait [#allocation7], 3072  }
   0xe   :  { %296 = vsyncadd [#allocation7], 4294964224  ;;  %v74_v0 = vld [vmem:[#allocation6 + $0x38] sm:$0xff]  ;;  %v73_v1 = vld [vmem:[#allocation6 + $0x30] sm:$0xff]  ;;  %vm95_vm0 = vcmask 523264   ;;  %s304_s10 = smov [#allocation9]  }
   0xf   :  { %107 = vmatpush.msra.mxu0 %v74_v0  ;;  %v72_v2 = vld [vmem:[#allocation6 + $0x28] sm:$0xff]  ;;  %v71_v3 = vld [vmem:[#allocation6 + $0x20] sm:$0xff]  ;;  %v70_v4 = vld [vmem:[#allocation6 + $0x18] sm:$0xff]  ;;  %s171_s11 = sshll.u32 %s304_s10, 4  ;;  %s173_s14 = sshll.u32 %s358_s5, 4  ;;  %s172_s11 = int_to_ptr.vmem [resolvable:$true] %s171_s11  ;;  %s174_s14 = int_to_ptr.hbm [resolvable:$true] %s173_s14 }
  0x10   :  { %v69_v5 = vld [vmem:[#allocation6 + $0x10] sm:$0xff]  ;;  %v68_v6 = vld [vmem:[#allocation6 + $0x8] sm:$0xff]  ;;  %v67_v7 = vld [vmem:[#allocation6] sm:$0xff] }
  0x11   :  { %108 = vmatpush.msra.mxu0 %v73_v1  ;;  %v66_v8 = vld [vmem:[#allocation3] sm:$0xf]  ;;  %v90_v10 = vld [vmem:[#allocation8 + $0x70] sm:$0xff]  ;;  %v89_v11 = vld [vmem:[#allocation8 + $0x68] sm:$0xff] }
  0x12   :  { %v91_v9 = vld [vmem:[#allocation8 + $0x78] sm:$0xff]  ;;  %v88_v12 = vld [vmem:[#allocation8 + $0x60] sm:$0xff]  ;;  %v86_v14 = vld [vmem:[#allocation8 + $0x50] sm:$0xff] }
  0x13   :  { %109 = vmatpush.msra.mxu0 %v72_v2  ;;  %138 = vmatpush.msra.mxu1 %v91_v9  ;;  %v87_v13 = vld [vmem:[#allocation8 + $0x58] sm:$0xff]  ;;  %v85_v15 = vld [vmem:[#allocation8 + $0x48] sm:$0xff]  ;;  %v84_v16 = vld [vmem:[#allocation8 + $0x40] sm:$0xff] }
  0x14   :  { %v83_v17 = vld [vmem:[#allocation8 + $0x38] sm:$0xff]  ;;  %v82_v18 = vld [vmem:[#allocation8 + $0x30] sm:$0xff]  ;;  %v81_v19 = vld [vmem:[#allocation8 + $0x28] sm:$0xff] }
  0x15   :  { %110 = vmatpush.msra.mxu0 %v71_v3  ;;  %139 = vmatpush.msra.mxu1 %v90_v10  ;;  %v80_v20 = vld [vmem:[#allocation8 + $0x20] sm:$0xff]  ;;  %v79_v21 = vld [vmem:[#allocation8 + $0x18] sm:$0xff]  ;;  %v78_v22 = vld [vmem:[#allocation8 + $0x10] sm:$0xff] }
  0x16   :  { %v191_v23 = vld [vmem:[%s355_s2] ss:$0 sm:$0xff]  ;;  %v77_v24 = vld [vmem:[#allocation8 + $0x8] sm:$0xff]  ;;  %v76_v25 = vld [vmem:[#allocation8] sm:$0xff] }
  0x17   :  { %111 = vmatpush.msra.mxu0 %v70_v4  ;;  %140 = vmatpush.msra.mxu1 %v89_v11  ;;  %v192_v44 = vld [vmem:[%s357_s4] ss:$0 sm:$0xff] }
  0x19   :  { %112 = vmatpush.msra.mxu0 %v69_v5  ;;  %141 = vmatpush.msra.mxu1 %v88_v12 }
  0x1b   :  { %113 = vmatpush.msra.mxu0 %v68_v6  ;;  %142 = vmatpush.msra.mxu1 %v87_v13 }
  0x1d   :  { %114 = vmatpush.msra.mxu0 %v67_v7  ;;  %143 = vmatpush.msra.mxu1 %v86_v14 }
  0x1e   :  { %184 = vmatmul.msk.f32.vlgmr.msra.gmra.mxu0 %vm95_vm0, %v66_v8 }
  0x1f   :  { %144 = vmatpush.msra.mxu1 %v85_v15 }
  0x21   :  { %145 = vmatpush.msra.mxu1 %v84_v16 }
  0x23   :  { %146 = vmatpush.msra.mxu1 %v83_v17 }
  0x25   :  { %147 = vmatpush.msra.mxu1 %v82_v18 }
  0x27   :  { %148 = vmatpush.msra.mxu1 %v81_v19 }
  0x29   :  { %149 = vmatpush.msra.mxu1 %v80_v20 }
  0x2b   :  { %150 = vmatpush.msra.mxu1 %v79_v21 }
  0x2d   :  { %151 = vmatpush.msra.mxu1 %v78_v22 }
  0x2f   :  { %152 = vmatpush.msra.mxu1 %v77_v24 }
  0x31   :  { %153 = vmatpush.msra.mxu1 %v76_v25 }
  0x9b   :  { %v116_v26 = vpop.f32.mrf.mxu0 }
  0x9c   :  { %v117_v27 = vadd.f32 %v191_v23, %v116_v26 }
  0x9e   :  { %v119_v28 = vsub.f32 0.0, %v117_v27 }
  0xa0   :  { %v120_v29 = vmul.f32 1.442695, %v119_v28 }
  0xa2   :  { %193 = vpow2.f32 %v120_v29 }
  0xa8   :  { %v194_v30 = vpop.eup %193 }
  0xa9   :  { %v122_v31 = vadd.f32 1.0, %v194_v30 }
  0xab   :  { %195 = vrcp.f32 %v122_v31  ;;  %v134_v35 = vand.u32 2147483648, %v122_v31  ;;  %v132_v37 = vand.u32 2147483647, %v122_v31  ;;  %vm128_vm2 = vweird.f32 %v122_v31 }
  0xad   :  { %v135_v39 = vor.u32 1.1754944e-38, %v134_v35  ;;  %vm133_vm4 = vcmp.eq.f32.partialorder %v132_v37, 8.507059e+37 }
  0xb1   :  { %v196_v32 = vpop.eup %195 }
  0xb2   :  { %v124_v33 = vmul.f32 %v196_v32, %v122_v31  ;;  %vm129_vm1 = vweird.f32 %v196_v32 }
  0xb3   :  { %vm130_vm3 = vmor %vm128_vm2, %vm129_vm1 }
  0xb4   :  { %v125_v34 = vsub.f32 1.0, %v124_v33 }
  0xb6   :  { %v126_v36 = vmul.f32 %v196_v32, %v125_v34 }
  0xb8   :  { %v127_v38 = vadd.f32 %v196_v32, %v126_v36 }
  0xba   :  { %v131_v40 = vsel %vm130_vm3, %v196_v32, %v127_v38 }
  0xbb   :  { %v136_v41 = vsel %vm133_vm4, %v135_v39, %v131_v40 }
  0xbc   :  { %v137_v42 = vmul.f32 %v136_v41, %v117_v27 }
  0xbe   :  { %154 = vmatmul.f32.vlgmr.msra.gmra.mxu1 %v137_v42 }
 0x13b   :  { %v155_v43 = vpop.f32.mrf.mxu1 }
 0x13c   :  { %158 = vst [vmem:[#allocation2] sm:$0xf] %v155_v43 }
 0x143   :  { %v159_v45 = vld [vmem:[#allocation2] sm:$0xf] }
 0x144   :  { %v164_v46 = vadd.f32 %v192_v44, %v159_v45 }
 0x146   :  { %165 = vst [vmem:[#allocation9] sm:$0xf] %v164_v46 }
 0x147   :  { %176 = dma.vmem_to_hbm [thread:$0]  %s172_s11, 64, %s174_s14, [#allocation5]  }
 0x148   :  { %297 = dma.done.wait [#allocation5], 64  }
 0x149   :  { %298 = vsyncadd [#allocation5], 4294967232 }
 0x14a   :  { %181 = vsyncpa [#allocation4], 1 }
 0x14b   :  { %182 = vsyncpa [#allocation7], 1 }
 0x14c   :  { %183 = vsyncpa [#allocation5], 1 }

</bundles_post_ra>
